<compile_context>
chip_gen: v7x
topology: tpu7x:2x2x1
jax: 0.10.0
libtpu: 0.0.40
codegen_flags: <defaults>
</compile_context>

<pallas_src>
import jax
import jax.numpy as jnp
from jax.experimental import pallas as pl
from jax.experimental.pallas import tpu as pltpu


def _round_up(x, m):
    return ((x + m - 1) // m) * m


def mnist_mlp_kernel(x_ref,
                     w1_ref, b1_ref,
                     w2_ref, b2_ref,
                     w3_ref, b3_ref,
                     w4_ref, b4_ref,
                     o_ref):
    # x_ref: (bm, 784) tile of the batch (any dtype); weights/biases are
    # f32 and VMEM-resident across all grid steps.  Upcast once per tile;
    # all matmuls accumulate in f32.
    x = x_ref[...].astype(jnp.float32)

    h = jnp.dot(x, w1_ref[...], preferred_element_type=jnp.float32) + b1_ref[...]
    h = jnp.maximum(h, 0.0)                                   # fc1 + relu

    h = jnp.dot(h, w2_ref[...], preferred_element_type=jnp.float32) + b2_ref[...]
    h = jnp.maximum(h, 0.0)                                   # fc2 + relu

    h = jnp.dot(h, w3_ref[...], preferred_element_type=jnp.float32) + b3_ref[...]
    h = jnp.maximum(h, 0.0)                                   # fc3 + relu

    h = jnp.dot(h, w4_ref[...], preferred_element_type=jnp.float32) + b4_ref[...]

    o_ref[...] = h.astype(o_ref.dtype)                        # fc4 (logits)


def _choose_batch_tiling(B, block_batch, align):
    """Balanced batch tiles: n steps, bm rows each, bm aligned to `align`."""
    bm_max = max(_round_up(block_batch, align), align)
    n = pl.cdiv(B, bm_max)            # steps needed at the max tile size
    if n < 2 and B >= 2 * align:
        n = 2                         # make sure v7x's second TC gets work
    if n > 1 and (n % 2) == 1:
        n += 1                        # even step count balances the two TCs
    bm = _round_up(pl.cdiv(B, n), align)
    n = pl.cdiv(B, bm)                # actual grid extent (last block may be ragged)
    return bm, n


def mnist_net_forward(x_nchw, params, *, block_batch=2048):
    """x_nchw: (B, 1, 28, 28) in f32/bf16 -> logits (B, 10) float32."""
    B = x_nchw.shape[0]
    x_flat = x_nchw.reshape(B, -1)                            # torch.flatten(x, 1)
    K = x_flat.shape[1]
    assert K == 784

    (w1, b1), (w2, b2), (w3, b3), (w4, b4) = params
    n_out = w4.shape[1]

    # Sublane alignment for the input dtype: 8 (f32), 16 (bf16/f16), 32 (int8).
    itemsize = jnp.dtype(x_flat.dtype).itemsize
    align = max(8, 32 // max(itemsize, 1))

    bm, n_steps = _choose_batch_tiling(B, block_batch, align)

    x_spec = pl.BlockSpec((bm, K), lambda i: (i, 0))
    out_spec = pl.BlockSpec((bm, n_out), lambda i: (i, 0))

    def resident(arr):
        # Constant index_map -> block never changes -> stays resident in VMEM.
        return pl.BlockSpec(arr.shape, lambda i: (0, 0))

    out = pl.pallas_call(
        mnist_mlp_kernel,
        out_shape=jax.ShapeDtypeStruct((B, n_out), jnp.float32),
        grid=(n_steps,),
        in_specs=[x_spec,
                  resident(w1), resident(b1),
                  resident(w2), resident(b2),
                  resident(w3), resident(b3),
                  resident(w4), resident(b4)],
        out_specs=out_spec,
        compiler_params=pltpu.CompilerParams(
            dimension_semantics=("parallel",),      # shard batch over TCs on v7x
            vmem_limit_bytes=48 * 1024 * 1024,      # < v7x's 64 MiB, ample on v5e/v6e
        ),
    )(x_flat, w1, b1, w2, b2, w3, b3, w4, b4)

    return out


def init_params(key):
    """Deterministic init matching nn.Linear shapes.

    Stored as (in, out) weight and (1, out) bias; equivalent to PyTorch's
    (out, in) weight transposed, so the kernel computes x @ W + b.
    """
    dims = [(784, 10), (10, 10), (10, 10), (10, 10)]
    params = []
    for (fan_in, fan_out) in dims:
        key, kw, kb = jax.random.split(key, 3)
        bound = 1.0 / jnp.sqrt(fan_in)             # PyTorch default U(-1/sqrt(fan_in), +)
        w = jax.random.uniform(kw, (fan_in, fan_out), jnp.float32, -bound, bound)
        b = jax.random.uniform(kb, (1, fan_out), jnp.float32, -bound, bound)
        params.append((w, b))
    return params


def reference_forward(x_nchw, params):
    """Pure-JAX reference for a sanity check (promotes x to f32 like the kernel)."""
    h = x_nchw.reshape(x_nchw.shape[0], -1).astype(jnp.float32)
    for i, (w, b) in enumerate(params):
        h = h @ w + b
        if i < 3:
            h = jnp.maximum(h, 0.0)
    return h


if __name__ == "__main__":
    key = jax.random.PRNGKey(0)
    key, kx1, kx2, kx3 = jax.random.split(key, 4)
    params = init_params(key)

    # 1) Small f32 batch (single ragged block, grid=(1,)).
    x_small = jax.random.normal(kx1, (2, 1, 28, 28), jnp.float32)
    out_small = jax.block_until_ready(mnist_net_forward(x_small, params))
    ref_small = reference_forward(x_small, params)
    assert out_small.shape == (2, 10)
    assert jnp.allclose(out_small, ref_small, atol=1e-4, rtol=1e-4), \
        "mismatch vs JAX reference (small f32 batch)"

    # 2) Ragged f32 batch with a small block_batch: exercises balanced multi-step
    #    grid + masked (pad-free) last block.
    x_ragged = jax.random.normal(kx2, (37, 1, 28, 28), jnp.float32)
    out_ragged = jax.block_until_ready(
        mnist_net_forward(x_ragged, params, block_batch=16))
    ref_ragged = reference_forward(x_ragged, params)
    assert out_ragged.shape == (37, 10)
    assert jnp.allclose(out_ragged, ref_ragged, atol=1e-4, rtol=1e-4), \
        "mismatch vs JAX reference (ragged f32 batch)"

    # 3) bf16 input path (half the dominant HBM stream); kernel upcasts in VMEM,
    #    accumulation stays f32.  Reference sees the same bf16-rounded pixels.
    x_bf16 = jax.random.normal(kx3, (64, 1, 28, 28), jnp.float32).astype(jnp.bfloat16)
    out_bf16 = jax.block_until_ready(mnist_net_forward(x_bf16, params))
    ref_bf16 = reference_forward(x_bf16, params)
    assert out_bf16.shape == (64, 10)
    assert out_bf16.dtype == jnp.float32
    assert jnp.allclose(out_bf16, ref_bf16, atol=1e-2, rtol=1e-2), \
        "mismatch vs JAX reference (bf16 batch)"

    print("KERNEL_OK")
</pallas_src>

<mosaic_0001>
module attributes {stable_mosaic.version = 11 : i64} {
  func.func @mnist_mlp_kernel(%arg0: i32, %arg1: memref<8x784xf32, #tpu.memory_space<vmem>>, %arg2: memref<784x10xf32, #tpu.memory_space<vmem>>, %arg3: memref<1x10xf32, #tpu.memory_space<vmem>>, %arg4: memref<10x10xf32, #tpu.memory_space<vmem>>, %arg5: memref<1x10xf32, #tpu.memory_space<vmem>>, %arg6: memref<10x10xf32, #tpu.memory_space<vmem>>, %arg7: memref<1x10xf32, #tpu.memory_space<vmem>>, %arg8: memref<10x10xf32, #tpu.memory_space<vmem>>, %arg9: memref<1x10xf32, #tpu.memory_space<vmem>>, %arg10: memref<8x10xf32, #tpu.memory_space<vmem>>) attributes {dimension_semantics = [#tpu.dimension_semantics<parallel>], iteration_bounds = array<i64: 1>, scalar_prefetch = 0 : i64, scratch_operands = 0 : i64, tpu.core_type = #tpu.core_type<tc>, window_params = [{transform_indices = @transform_0, window_bounds = array<i64: 8, 784>}, {pipeline_mode = #tpu.pipeline_mode<synchronous>, transform_indices = @transform_1, window_bounds = array<i64: 784, 10>}, {pipeline_mode = #tpu.pipeline_mode<synchronous>, transform_indices = @transform_2, window_bounds = array<i64: 1, 10>}, {pipeline_mode = #tpu.pipeline_mode<synchronous>, transform_indices = @transform_3, window_bounds = array<i64: 10, 10>}, {pipeline_mode = #tpu.pipeline_mode<synchronous>, transform_indices = @transform_4, window_bounds = array<i64: 1, 10>}, {pipeline_mode = #tpu.pipeline_mode<synchronous>, transform_indices = @transform_5, window_bounds = array<i64: 10, 10>}, {pipeline_mode = #tpu.pipeline_mode<synchronous>, transform_indices = @transform_6, window_bounds = array<i64: 1, 10>}, {pipeline_mode = #tpu.pipeline_mode<synchronous>, transform_indices = @transform_7, window_bounds = array<i64: 10, 10>}, {pipeline_mode = #tpu.pipeline_mode<synchronous>, transform_indices = @transform_8, window_bounds = array<i64: 1, 10>}, {transform_indices = @transform_9, window_bounds = array<i64: 8, 10>}]} {
    %c0 = arith.constant 0 : index
    %c0_0 = arith.constant 0 : index
    %0 = vector.load %arg1[%c0, %c0_0] : memref<8x784xf32, #tpu.memory_space<vmem>>, vector<8x784xf32>
    %c0_1 = arith.constant 0 : index
    %c0_2 = arith.constant 0 : index
    %1 = vector.load %arg2[%c0_1, %c0_2] : memref<784x10xf32, #tpu.memory_space<vmem>>, vector<784x10xf32>
    %cst = arith.constant dense<0.000000e+00> : vector<8x10xf32>
    %2 = tpu.matmul %0, %1, %cst {dimension_numbers = #tpu.dot_dimension_numbers<[1], [0], [0], [1], [0, 0, 1, 1], [], []>} : vector<8x784xf32>, vector<784x10xf32>, vector<8x10xf32> -> vector<8x10xf32>
    %c0_3 = arith.constant 0 : index
    %c0_4 = arith.constant 0 : index
    %3 = vector.load %arg3[%c0_3, %c0_4] : memref<1x10xf32, #tpu.memory_space<vmem>>, vector<1x10xf32>
    %4 = vector.broadcast %3 : vector<1x10xf32> to vector<8x10xf32>
    %5 = arith.addf %2, %4 : vector<8x10xf32>
    %cst_5 = arith.constant 0.000000e+00 : f32
    %6 = vector.broadcast %cst_5 : f32 to vector<8x10xf32>
    %7 = arith.maximumf %5, %6 : vector<8x10xf32>
    %c0_6 = arith.constant 0 : index
    %c0_7 = arith.constant 0 : index
    %8 = vector.load %arg4[%c0_6, %c0_7] : memref<10x10xf32, #tpu.memory_space<vmem>>, vector<10x10xf32>
    %cst_8 = arith.constant dense<0.000000e+00> : vector<8x10xf32>
    %9 = tpu.matmul %7, %8, %cst_8 {dimension_numbers = #tpu.dot_dimension_numbers<[1], [0], [0], [1], [0, 0, 1, 1], [], []>} : vector<8x10xf32>, vector<10x10xf32>, vector<8x10xf32> -> vector<8x10xf32>
    %c0_9 = arith.constant 0 : index
    %c0_10 = arith.constant 0 : index
    %10 = vector.load %arg5[%c0_9, %c0_10] : memref<1x10xf32, #tpu.memory_space<vmem>>, vector<1x10xf32>
    %11 = vector.broadcast %10 : vector<1x10xf32> to vector<8x10xf32>
    %12 = arith.addf %9, %11 : vector<8x10xf32>
    %cst_11 = arith.constant 0.000000e+00 : f32
    %13 = vector.broadcast %cst_11 : f32 to vector<8x10xf32>
    %14 = arith.maximumf %12, %13 : vector<8x10xf32>
    %c0_12 = arith.constant 0 : index
    %c0_13 = arith.constant 0 : index
    %15 = vector.load %arg6[%c0_12, %c0_13] : memref<10x10xf32, #tpu.memory_space<vmem>>, vector<10x10xf32>
    %cst_14 = arith.constant dense<0.000000e+00> : vector<8x10xf32>
    %16 = tpu.matmul %14, %15, %cst_14 {dimension_numbers = #tpu.dot_dimension_numbers<[1], [0], [0], [1], [0, 0, 1, 1], [], []>} : vector<8x10xf32>, vector<10x10xf32>, vector<8x10xf32> -> vector<8x10xf32>
    %c0_15 = arith.constant 0 : index
    %c0_16 = arith.constant 0 : index
    %17 = vector.load %arg7[%c0_15, %c0_16] : memref<1x10xf32, #tpu.memory_space<vmem>>, vector<1x10xf32>
    %18 = vector.broadcast %17 : vector<1x10xf32> to vector<8x10xf32>
    %19 = arith.addf %16, %18 : vector<8x10xf32>
    %cst_17 = arith.constant 0.000000e+00 : f32
    %20 = vector.broadcast %cst_17 : f32 to vector<8x10xf32>
    %21 = arith.maximumf %19, %20 : vector<8x10xf32>
    %c0_18 = arith.constant 0 : index
    %c0_19 = arith.constant 0 : index
    %22 = vector.load %arg8[%c0_18, %c0_19] : memref<10x10xf32, #tpu.memory_space<vmem>>, vector<10x10xf32>
    %cst_20 = arith.constant dense<0.000000e+00> : vector<8x10xf32>
    %23 = tpu.matmul %21, %22, %cst_20 {dimension_numbers = #tpu.dot_dimension_numbers<[1], [0], [0], [1], [0, 0, 1, 1], [], []>} : vector<8x10xf32>, vector<10x10xf32>, vector<8x10xf32> -> vector<8x10xf32>
    %c0_21 = arith.constant 0 : index
    %c0_22 = arith.constant 0 : index
    %24 = vector.load %arg9[%c0_21, %c0_22] : memref<1x10xf32, #tpu.memory_space<vmem>>, vector<1x10xf32>
    %25 = vector.broadcast %24 : vector<1x10xf32> to vector<8x10xf32>
    %26 = arith.addf %23, %25 : vector<8x10xf32>
    %c0_23 = arith.constant 0 : index
    %c0_24 = arith.constant 0 : index
    %27 = vector.load %arg10[%c0_23, %c0_24] : memref<8x10xf32, #tpu.memory_space<vmem>>, vector<8x10xf32>
    tpu.vector_store %arg10[%c0_23, %c0_24], %26 {strides = array<i32>} : memref<8x10xf32, #tpu.memory_space<vmem>>, vector<8x10xf32>,
    return
  }
  func.func @transform_0(%arg0: i32) -> (i32, i32) {
    %c0_i32 = arith.constant 0 : i32
    %c0_i32_0 = arith.constant 0 : i32
    return %arg0, %c0_i32 : i32, i32
  }
  func.func @transform_1(%arg0: i32) -> (i32, i32) {
    %c0_i32 = arith.constant 0 : i32
    %c0_i32_0 = arith.constant 0 : i32
    %c0_i32_1 = arith.constant 0 : i32
    return %c0_i32, %c0_i32_0 : i32, i32
  }
  func.func @transform_2(%arg0: i32) -> (i32, i32) {
    %c0_i32 = arith.constant 0 : i32
    %c0_i32_0 = arith.constant 0 : i32
    %c0_i32_1 = arith.constant 0 : i32
    return %c0_i32, %c0_i32_0 : i32, i32
  }
  func.func @transform_3(%arg0: i32) -> (i32, i32) {
    %c0_i32 = arith.constant 0 : i32
    %c0_i32_0 = arith.constant 0 : i32
    %c0_i32_1 = arith.constant 0 : i32
    return %c0_i32, %c0_i32_0 : i32, i32
  }
  func.func @transform_4(%arg0: i32) -> (i32, i32) {
    %c0_i32 = arith.constant 0 : i32
    %c0_i32_0 = arith.constant 0 : i32
    %c0_i32_1 = arith.constant 0 : i32
    return %c0_i32, %c0_i32_0 : i32, i32
  }
  func.func @transform_5(%arg0: i32) -> (i32, i32) {
    %c0_i32 = arith.constant 0 : i32
    %c0_i32_0 = arith.constant 0 : i32
    %c0_i32_1 = arith.constant 0 : i32
    return %c0_i32, %c0_i32_0 : i32, i32
  }
  func.func @transform_6(%arg0: i32) -> (i32, i32) {
    %c0_i32 = arith.constant 0 : i32
    %c0_i32_0 = arith.constant 0 : i32
    %c0_i32_1 = arith.constant 0 : i32
    return %c0_i32, %c0_i32_0 : i32, i32
  }
  func.func @transform_7(%arg0: i32) -> (i32, i32) {
    %c0_i32 = arith.constant 0 : i32
    %c0_i32_0 = arith.constant 0 : i32
    %c0_i32_1 = arith.constant 0 : i32
    return %c0_i32, %c0_i32_0 : i32, i32
  }
  func.func @transform_8(%arg0: i32) -> (i32, i32) {
    %c0_i32 = arith.constant 0 : i32
    %c0_i32_0 = arith.constant 0 : i32
    %c0_i32_1 = arith.constant 0 : i32
    return %c0_i32, %c0_i32_0 : i32, i32
  }
  func.func @transform_9(%arg0: i32) -> (i32, i32) {
    %c0_i32 = arith.constant 0 : i32
    %c0_i32_0 = arith.constant 0 : i32
    return %arg0, %c0_i32 : i32, i32
  }
}

</mosaic_0001>

<bundles_post_ra>
// kernel: tpu_custom_call.1
= control target key start
LH: loop header
LB: loop body
LE: loop exit
PB: predicated region body
PF: predicated region fallthrough
CT: control target
= control target key end

     0   :  { %14 = vsyncpa [#allocation3], 0  ;;  %v1102_v51 = vmov 1983009808   ;;  %v161_v53 = vlaneseq  ;;  %vm1104_vm0 = vmmov 0   ;;  %vm231_vm1 = vcmask 130048   ;;  %s1556_s0 = inlined_call_operand.vmem [shape: f32[2,784], index: 0, kind: input, shape index: {}]   ;;  %s1557_s1 = inlined_call_operand.vmem [shape: f32[784,10], index: 1, kind: input, shape index: {}]   ;;  %s1558_s2 = inlined_call_operand.vmem [shape: f32[1,10], index: 2, kind: input, shape index: {}]   ;;  %s1559_s3 = inlined_call_operand.vmem [shape: f32[10,10], index: 3, kind: input, shape index: {}]   ;;  %s1560_s4 = inlined_call_operand.vmem [shape: f32[1,10], index: 4, kind: input, shape index: {}]   ;;  %s1561_s5 = inlined_call_operand.vmem [shape: f32[10,10], index: 5, kind: input, shape index: {}]   ;;  %s1562_s6 = inlined_call_operand.vmem [shape: f32[1,10], index: 6, kind: input, shape index: {}]   ;;  %s1563_s7 = inlined_call_operand.vmem [shape: f32[10,10], index: 7, kind: input, shape index: {}]   ;;  %s1564_s8 = inlined_call_operand.vmem [shape: f32[1,10], index: 8, kind: input, shape index: {}]   ;;  %s1565_s9 = inlined_call_operand.hbm [shape: f32[2,10], index: 9, kind: output, shape index: {}]  }
   0x1   :  { %v57_v0 = vld [vmem:[%s1557_s1 + $0x80] sm:$0xff]  ;;  %v58_v1 = vld [vmem:[%s1557_s1 + $0x88] sm:$0xff]  ;;  %v59_v12 = vld [vmem:[%s1557_s1 + $0x90] sm:$0xff]  ;;  %v159_v52 = vunpack.c.l.s4 %v1102_v51  ;;  %vm528_vm2 = vcmask 1041408   ;;  %vm1106_vm3 = vmmov 1   ;;  %vm524_vm5 = vcmask 80896  }
   0x2   :  { %v947_v2 = vpack.c.bf16 %v58_v1, %v57_v0  ;;  %v41_v3 = vld [vmem:[%s1557_s1] sm:$0xff]  ;;  %v42_v4 = vld [vmem:[%s1557_s1 + $0x8] sm:$0xff]  ;;  %v60_v13 = vld [vmem:[%s1557_s1 + $0x98] sm:$0xff] }
   0x3   :  { %v89_v5 = vld [vmem:[%s1557_s1 + $0x180] sm:$0xff]  ;;  %v949_v6 = vpack.c.bf16 %v42_v4, %v41_v3  ;;  %v90_v7 = vld [vmem:[%s1557_s1 + $0x188] sm:$0xff]  ;;  %v43_v14 = vld [vmem:[%s1557_s1 + $0x10] sm:$0xff]  ;;  %v951_v15 = vpack.c.bf16 %v60_v13, %v59_v12  ;;  %v162_v3 = vshrl.u32 %v161_v53, 7 }
   0x4   :  { %v73_v8 = vld [vmem:[%s1557_s1 + $0x100] sm:$0xff]  ;;  %v74_v9 = vld [vmem:[%s1557_s1 + $0x108] sm:$0xff]  ;;  %948 = vmatprep.subr.bf16.mxu0 %v947_v2  ;;  %v979_v10 = vpack.c.bf16 %v90_v7, %v89_v5  ;;  %v44_v16 = vld [vmem:[%s1557_s1 + $0x18] sm:$0xff]  ;;  %v160_v2 = vunpack.c.0.s8 %v159_v52 }
   0x5   :  { %v981_v11 = vpack.c.bf16 %v74_v9, %v73_v8  ;;  %950 = vmatpush3.bf16.msra.mxu0 %v949_v6  ;;  %v91_v17 = vld [vmem:[%s1557_s1 + $0x190] sm:$0xff]  ;;  %v92_v18 = vld [vmem:[%s1557_s1 + $0x198] sm:$0xff]  ;;  %v953_v19 = vpack.c.bf16 %v44_v16, %v43_v14  ;;  %v61_v23 = vld [vmem:[%s1557_s1 + $0xa0] sm:$0xff] }
   0x6   :  { %980 = vmatprep.subr.bf16.mxu1 %v979_v10  ;;  %v983_v20 = vpack.c.bf16 %v92_v18, %v91_v17  ;;  %v75_v21 = vld [vmem:[%s1557_s1 + $0x110] sm:$0xff]  ;;  %v76_v22 = vld [vmem:[%s1557_s1 + $0x118] sm:$0xff]  ;;  %952 = vmatprep.subr.bf16.mxu0 %v951_v15  ;;  %v62_v25 = vld [vmem:[%s1557_s1 + $0xa8] sm:$0xff] }
   0x7   :  { %982 = vmatpush3.bf16.msra.mxu1 %v981_v11  ;;  %v985_v24 = vpack.c.bf16 %v76_v22, %v75_v21  ;;  %v45_v26 = vld [vmem:[%s1557_s1 + $0x20] sm:$0xff]  ;;  %v46_v27 = vld [vmem:[%s1557_s1 + $0x28] sm:$0xff]  ;;  %v955_v28 = vpack.c.bf16 %v62_v25, %v61_v23  ;;  %v63_v35 = vld [vmem:[%s1557_s1 + $0xb0] sm:$0xff] }
   0x8   :  { %984 = vmatprep.subr.bf16.mxu1 %v983_v20  ;;  %v93_v29 = vld [vmem:[%s1557_s1 + $0x1a0] sm:$0xff]  ;;  %v94_v30 = vld [vmem:[%s1557_s1 + $0x1a8] sm:$0xff]  ;;  %v957_v32 = vpack.c.bf16 %v46_v27, %v45_v26  ;;  %v64_v36 = vld [vmem:[%s1557_s1 + $0xb8] sm:$0xff]  ;;  %v1328_v20 = vsub.s32 %v160_v2, %v162_v3 }
   0x9   :  { %v77_v31 = vld [vmem:[%s1557_s1 + $0x120] sm:$0xff]  ;;  %954 = vmatpush3.bf16.msra.mxu0 %v953_v19  ;;  %v987_v33 = vpack.c.bf16 %v94_v30, %v93_v29  ;;  %v78_v34 = vld [vmem:[%s1557_s1 + $0x128] sm:$0xff]  ;;  %v959_v37 = vpack.c.bf16 %v64_v36, %v63_v35  ;;  %v47_v38 = vld [vmem:[%s1557_s1 + $0x30] sm:$0xff] }
   0xa   :  { %956 = vmatprep.subr.bf16.mxu0 %v955_v28  ;;  %v48_v39 = vld [vmem:[%s1557_s1 + $0x38] sm:$0xff]  ;;  %v95_v40 = vld [vmem:[%s1557_s1 + $0x1b0] sm:$0xff]  ;;  %v989_v41 = vpack.c.bf16 %v78_v34, %v77_v31  ;;  %v65_v46 = vld [vmem:[%s1557_s1 + $0xc0] sm:$0xff] }
   0xb   :  { %986 = vmatpush3.bf16.msra.mxu1 %v985_v24  ;;  %v96_v42 = vld [vmem:[%s1557_s1 + $0x1b8] sm:$0xff]  ;;  %v79_v43 = vld [vmem:[%s1557_s1 + $0x130] sm:$0xff]  ;;  %v66_v47 = vld [vmem:[%s1557_s1 + $0xc8] sm:$0xff]  ;;  %v961_v48 = vpack.c.bf16 %v48_v39, %v47_v38 }
   0xc   :  { %988 = vmatprep.subr.bf16.mxu1 %v987_v33  ;;  %v991_v44 = vpack.c.bf16 %v96_v42, %v95_v40  ;;  %v80_v45 = vld [vmem:[%s1557_s1 + $0x138] sm:$0xff]  ;;  %v97_v49 = vld [vmem:[%s1557_s1 + $0x1c0] sm:$0xff]  ;;  %v98_v50 = vld [vmem:[%s1557_s1 + $0x1c8] sm:$0xff]  ;;  %v963_v54 = vpack.c.bf16 %v66_v47, %v65_v46 }
   0xd   :  { %958 = vmatpush3.bf16.msra.mxu0 %v957_v32  ;;  %v49_v55 = vld [vmem:[%s1557_s1 + $0x40] sm:$0xff]  ;;  %v50_v56 = vld [vmem:[%s1557_s1 + $0x48] sm:$0xff]  ;;  %v993_v57 = vpack.c.bf16 %v80_v45, %v79_v43  ;;  %v67_v58 = vld [vmem:[%s1557_s1 + $0xd0] sm:$0xff]  ;;  %v995_v60 = vpack.c.bf16 %v98_v50, %v97_v49 }
   0xe   :  { %960 = vmatprep.subr.bf16.mxu0 %v959_v37  ;;  %v68_v59 = vld [vmem:[%s1557_s1 + $0xd8] sm:$0xff]  ;;  %v81_v61 = vld [vmem:[%s1557_s1 + $0x140] sm:$0xff]  ;;  %v82_v62 = vld [vmem:[%s1557_s1 + $0x148] sm:$0xff]  ;;  %v965_v63 = vpack.c.bf16 %v50_v56, %v49_v55 }
   0xf   :  { %990 = vmatpush3.bf16.msra.mxu1 %v989_v41  ;;  %v99_v0 = vld [vmem:[%s1557_s1 + $0x1d0] sm:$0xff]  ;;  %v100_v1 = vld [vmem:[%s1557_s1 + $0x1d8] sm:$0xff]  ;;  %v967_v4 = vpack.c.bf16 %v68_v59, %v67_v58  ;;  %v997_v8 = vpack.c.bf16 %v82_v62, %v81_v61  ;;  %v69_v10 = vld [vmem:[%s1557_s1 + $0xe0] sm:$0xff] }
  0x10   :  { %992 = vmatprep.subr.bf16.mxu1 %v991_v44  ;;  %v51_v5 = vld [vmem:[%s1557_s1 + $0x50] sm:$0xff]  ;;  %v52_v6 = vld [vmem:[%s1557_s1 + $0x58] sm:$0xff]  ;;  %v70_v11 = vld [vmem:[%s1557_s1 + $0xe8] sm:$0xff]  ;;  %v999_v12 = vpack.c.bf16 %v100_v1, %v99_v0  ;;  %v1103_v1 = vmov 0.0|0.0  }
  0x11   :  { %962 = vmatpush3.bf16.msra.mxu0 %v961_v48  ;;  %v83_v7 = vld [vmem:[%s1557_s1 + $0x150] sm:$0xff]  ;;  %v84_v9 = vld [vmem:[%s1557_s1 + $0x158] sm:$0xff]  ;;  %v53_v13 = vld [vmem:[%s1557_s1 + $0x60] sm:$0xff]  ;;  %v969_v16 = vpack.c.bf16 %v52_v6, %v51_v5  ;;  %v971_v21 = vpack.c.bf16 %v70_v11, %v69_v10 }
  0x12   :  { %964 = vmatprep.subr.bf16.mxu0 %v963_v54  ;;  %v54_v14 = vld [vmem:[%s1557_s1 + $0x68] sm:$0xff]  ;;  %v101_v15 = vld [vmem:[%s1557_s1 + $0x1e0] sm:$0xff]  ;;  %v71_v18 = vld [vmem:[%s1557_s1 + $0xf0] sm:$0xff]  ;;  %v1001_v22 = vpack.c.bf16 %v84_v9, %v83_v7 }
  0x13   :  { %994 = vmatpush3.bf16.msra.mxu1 %v993_v57  ;;  %v102_v17 = vld [vmem:[%s1557_s1 + $0x1e8] sm:$0xff]  ;;  %v72_v19 = vld [vmem:[%s1557_s1 + $0xf8] sm:$0xff]  ;;  %v85_v26 = vld [vmem:[%s1557_s1 + $0x160] sm:$0xff]  ;;  %v973_v29 = vpack.c.bf16 %v54_v14, %v53_v13  ;;  %v1105_v14 = vmov 0.0  }
  0x14   :  { %996 = vmatprep.subr.bf16.mxu1 %v995_v60  ;;  %v1066_v23 = vld [vmem:[%s1556_s0] ss:$14 sps:$4 sm:$0xff]   ;;  %v1068_v24 = vld [vmem:[%s1556_s0 + $0x1c] ss:$14 sps:$4 sm:$0xff]   ;;  %v1003_v25 = vpack.c.bf16 %v102_v17, %v101_v15  ;;  %v1070_v33 = vld [vmem:[%s1556_s0 + $0x4] ss:$14 sps:$4 sm:$0xff]   ;;  %v975_v35 = vpack.c.bf16 %v72_v19, %v71_v18 }
  0x15   :  { %966 = vmatpush3.bf16.msra.mxu0 %v965_v63  ;;  %v86_v27 = vld [vmem:[%s1557_s1 + $0x168] sm:$0xff]  ;;  %v103_v28 = vld [vmem:[%s1557_s1 + $0x1f0] sm:$0xff]  ;;  %v104_v30 = vld [vmem:[%s1557_s1 + $0x1f8] sm:$0xff]  ;;  %v164_v31 = vrot.slane %v1066_v23, %v1328_v20  ;;  %v178_v32 = vrot.slane %v1068_v24, %v1328_v20  ;;  %v171_v42 = vrot.slane %v1070_v33, %v1328_v20 }
  0x16   :  { %968 = vmatprep.subr.bf16.mxu0 %v967_v4  ;;  %v1071_v34 = vld [vmem:[%s1556_s0 + $0x20] ss:$14 sps:$4 sm:$0xff]   ;;  %v56_v37 = vld [vmem:[%s1557_s1 + $0x78] sm:$0xff]  ;;  %v1005_v38 = vpack.c.bf16 %v86_v27, %v85_v26  ;;  %v1007_v44 = vpack.c.bf16 %v104_v30, %v103_v28  ;;  %v1075_v5 = vld [vmem:[%s1556_s0 + $0x24] ss:$14 sps:$4 sm:$0xff]  }
  0x17   :  { %998 = vmatpush3.bf16.msra.mxu1 %v997_v8  ;;  %v55_v36 = vld [vmem:[%s1557_s1 + $0x70] sm:$0xff]  ;;  %v187_v39 = vcombine.high %v164_v31, %v178_v32  ;;  %v121_v40 = vld [vmem:[%s1557_s1 + $0x280] sm:$0xff]  ;;  %v122_v41 = vld [vmem:[%s1557_s1 + $0x288] sm:$0xff]  ;;  %v185_v43 = vrot.slane %v1071_v34, %v1328_v20  ;;  %v186_v55 = vcombine.low %v164_v31, %v178_v32  ;;  %v214_v11 = vrot.slane %v1075_v5, %v1328_v20 }
  0x18   :  { %1000 = vmatprep.subr.bf16.mxu1 %v999_v12  ;;  %v87_v45 = vld [vmem:[%s1557_s1 + $0x170] sm:$0xff]  ;;  %v88_v46 = vld [vmem:[%s1557_s1 + $0x178] sm:$0xff]  ;;  %v977_v47 = vpack.c.bf16 %v56_v37, %v55_v36  ;;  %v1011_v49 = vpack.c.bf16 %v122_v41, %v121_v40  ;;  %v105_v50 = vld [vmem:[%s1557_s1 + $0x200] sm:$0xff] }
  0x19   :  { %970 = vmatpush3.bf16.msra.mxu0 %v969_v16  ;;  %298 = vmatprep.mubr.f32.mxu0 %v187_v39  ;;  %v189_v48 = vcombine.high %v171_v42, %v185_v43  ;;  %v106_v51 = vld [vmem:[%s1557_s1 + $0x208] sm:$0xff]  ;;  %v1009_v52 = vpack.c.bf16 %v88_v46, %v87_v45  ;;  %v123_v53 = vld [vmem:[%s1557_s1 + $0x290] sm:$0xff]  ;;  %v124_v54 = vld [vmem:[%s1557_s1 + $0x298] sm:$0xff]  ;;  %v188_v57 = vcombine.low %v171_v42, %v185_v43 }
  0x1a   :  { %972 = vmatprep.subr.bf16.mxu0 %v971_v21  ;;  %v1013_v56 = vpack.c.bf16 %v106_v51, %v105_v50  ;;  %v1015_v58 = vpack.c.bf16 %v124_v54, %v123_v53  ;;  %v107_v59 = vld [vmem:[%s1557_s1 + $0x210] sm:$0xff]  ;;  %v108_v60 = vld [vmem:[%s1557_s1 + $0x218] sm:$0xff]  ;;  %v125_v61 = vld [vmem:[%s1557_s1 + $0x2a0] sm:$0xff] }
  0x1b   :  { %1002 = vmatpush3.bf16.msra.mxu1 %v1001_v22  ;;  %368 = vmatprep.mubr.f32.mxu1 %v189_v48  ;;  %v126_v62 = vld [vmem:[%s1557_s1 + $0x2a8] sm:$0xff]  ;;  %v109_v63 = vld [vmem:[%s1557_s1 + $0x220] sm:$0xff]  ;;  %v1017_v2 = vpack.c.bf16 %v108_v60, %v107_v59  ;;  %v127_v3 = vld [vmem:[%s1557_s1 + $0x2b0] sm:$0xff] }
  0x1c   :  { %1004 = vmatprep.subr.bf16.mxu1 %v1003_v25  ;;  %v110_v0 = vld [vmem:[%s1557_s1 + $0x228] sm:$0xff]  ;;  %v1019_v6 = vpack.c.bf16 %v126_v62, %v125_v61  ;;  %v128_v9 = vld [vmem:[%s1557_s1 + $0x2b8] sm:$0xff]  ;;  %v137_v12 = vld [vmem:[%s1557_s1 + $0x300] sm:$0xff] }
  0x1d   :  { %974 = vmatpush3.bf16.msra.mxu0 %v973_v29  ;;  %v1072_v4 = vld [vmem:[%s1556_s0 + $0x8] ss:$14 sps:$4 sm:$0xff]   ;;  %v1074_v7 = vld [vmem:[%s1556_s0 + $0xc] ss:$14 sps:$4 sm:$0x33]   ;;  %v1021_v18 = vpack.c.bf16 %v110_v0, %v109_v63  ;;  %v1023_v21 = vpack.c.bf16 %v128_v9, %v127_v3  ;;  %v113_v28 = vld [vmem:[%s1557_s1 + $0x240] sm:$0xff] }
  0x1e   :  { %976 = vmatprep.subr.bf16.mxu0 %v975_v35  ;;  %v1077_v8 = vld [vmem:[%s1556_s0 + $0x28] ss:$14 sps:$4 sm:$0x33]   ;;  %v200_v10 = vrot.slane %v1072_v4, %v1328_v20  ;;  %v207_v15 = vrot.slane %v1074_v7, %v1328_v20  ;;  %v112_v23 = vld [vmem:[%s1557_s1 + $0x238] sm:$0xff]  ;;  %v133_v36 = vld [vmem:[%s1557_s1 + $0x2e0] sm:$0xff] }
  0x1f   :  { %1006 = vmatpush3.bf16.msra.mxu1 %v1005_v38  ;;  %v138_v13 = vld [vmem:[%s1557_s1 + $0x308] sm:$0xff]  ;;  %v221_v16 = vrot.slane %v1077_v8, %v1328_v20  ;;  %v111_v22 = vld [vmem:[%s1557_s1 + $0x230] sm:$0xff]  ;;  %v129_v20 = vld [vmem:[%s1557_s1 + $0x2c0] sm:$0xff] }
  0x20   :  { %1008 = vmatprep.subr.bf16.mxu1 %v1007_v44  ;;  %v1044_v17 = vpack.c.bf16 %v138_v13, %v137_v12  ;;  %v223_v19 = vcombine.high %v200_v10, %v214_v11  ;;  %v130_v25 = vld [vmem:[%s1557_s1 + $0x2c8] sm:$0xff]  ;;  %v1025_v26 = vpack.c.bf16 %v112_v23, %v111_v22  ;;  %v131_v30 = vld [vmem:[%s1557_s1 + $0x2d0] sm:$0xff]  ;;  %v132_v31 = vld [vmem:[%s1557_s1 + $0x2d8] sm:$0xff] }
  0x21   :  { %978 = vmatpush3.bf16.msra.mxu0 %v977_v47  ;;  %v224_v24 = vcombine.low %v207_v15, %v221_v16  ;;  %v1027_v27 = vpack.c.bf16 %v130_v25, %v129_v20  ;;  %v114_v29 = vld [vmem:[%s1557_s1 + $0x248] sm:$0xff]  ;;  %v1031_v33 = vpack.c.bf16 %v132_v31, %v131_v30  ;;  %v115_v34 = vld [vmem:[%s1557_s1 + $0x250] sm:$0xff]  ;;  %v116_v35 = vld [vmem:[%s1557_s1 + $0x258] sm:$0xff] }
  0x22   :  { %1012 = vmatprep.subr.bf16.mxu0 %v1011_v49  ;;  %v1029_v32 = vpack.c.bf16 %v114_v29, %v113_v28  ;;  %v134_v37 = vld [vmem:[%s1557_s1 + $0x2e8] sm:$0xff]  ;;  %v1033_v38 = vpack.c.bf16 %v116_v35, %v115_v34  ;;  %v117_v40 = vld [vmem:[%s1557_s1 + $0x260] sm:$0xff]  ;;  %v135_v42 = vld [vmem:[%s1557_s1 + $0x2f0] sm:$0xff]  ;;  %v222_v49 = vcombine.low %v200_v10, %v214_v11 }
  0x23   :  { %1010 = vmatpush3.bf16.msra.mxu1 %v1009_v52  ;;  %v1035_v39 = vpack.c.bf16 %v134_v37, %v133_v36  ;;  %v118_v41 = vld [vmem:[%s1557_s1 + $0x268] sm:$0xff]  ;;  %v136_v43 = vld [vmem:[%s1557_s1 + $0x2f8] sm:$0xff]  ;;  %v119_v46 = vld [vmem:[%s1557_s1 + $0x270] sm:$0xff] }
  0x24   :  { %299 = vmatmul.mubr.f32.vlgmr.msra.gmra.mrb[0].mxu0 %v186_v55  ;;  %1043 = vmatprep.subr.bf16.mxu1 %v1103_v1  ;;  %v1037_v44 = vpack.c.bf16 %v118_v41, %v117_v40  ;;  %v1039_v45 = vpack.c.bf16 %v136_v43, %v135_v42  ;;  %v120_v47 = vld [vmem:[%s1557_s1 + $0x278] sm:$0xff]  ;;  %v515_v50 = vld [vmem:[%s1559_s3] sm:$0xff]  ;;  %v516_v51 = vld [vmem:[%s1559_s3 + $0x8] sm:$0x3] }
  0x25   :  { %1014 = vmatpush3.bf16.msra.mxu0 %v1013_v56  ;;  %438 = vmatprep.mubr.f32.mxu0 %v223_v19  ;;  %v1041_v48 = vpack.c.bf16 %v120_v47, %v119_v46  ;;  %v1047_v52 = vpack.c.bf16 %v516_v51, %v515_v50  ;;  %vm1500_vm4 = vmpackc.low %vm528_vm2, %vm1106_vm3  ;;  %v791_v55 = vld [vmem:[%s1558_s2] ss:$0 sm:$0xff]  ;;  %v604_v9 = vld [vmem:[%s1561_s5 + $0x8] sm:$0x3] }
  0x26   :  { %369 = vmatmul.mubr.f32.vlgmr.msra.gmra.mrb[0].mxu1 %v188_v57  ;;  %1016 = vmatprep.subr.bf16.mxu0 %v1015_v58  ;;  %v603_v8 = vld [vmem:[%s1561_s5] sm:$0xff] }
  0x27   :  { %923 = vmatprep.mubr.msk.f32.mxu1 %vm1104_vm0, %v1105_v14  ;;  %1045 = vmatpush3.bf16.msra.mxu1 %v1044_v17  ;;  %v1051_v10 = vpack.c.bf16 %v604_v9, %v603_v8  ;;  %v793_v11 = vld [vmem:[%s1560_s4] ss:$0 sm:$0xff] }
  0x28   :  { %1046 = vmatprep.subr.bf16.mxu1 %v1103_v1  ;;  %v689_v17 = vld [vmem:[%s1563_s7] sm:$0xff] }
  0x29   :  { %1018 = vmatpush3.bf16.msra.mxu0 %v1017_v2  ;;  %v796_v19 = vld [vmem:[%s1562_s6] ss:$0 sm:$0xff] }
  0x2a   :  { %1020 = vmatprep.subr.bf16.mxu0 %v1019_v6  ;;  %924 = vmatmul.mubr.msk.f32.vlgmr.msra.gmra.mrb[2].mxu1 %vm231_vm1, %v224_v24  ;;  %v799_v24 = vld [vmem:[%s1564_s8] ss:$0 sm:$0xff] }
  0x2b   :  { %930 = vmatprep.mubr.msk.f32.mxu1 %vm1104_vm0, %v1105_v14  ;;  %1049 = vmatpush3.bf16.msk.msra.mxu1 %vm1500_vm4, %v1047_v52 }
  0x2c   :  { %1050 = vmatprep.subr.bf16.mxu1 %v1103_v1 }
  0x2d   :  { %1022 = vmatpush3.bf16.msra.mxu0 %v1021_v18 }
  0x2e   :  { %1024 = vmatprep.subr.bf16.mxu0 %v1023_v21 }
  0x31   :  { %1026 = vmatpush3.bf16.msra.mxu0 %v1025_v26 }
  0x32   :  { %1028 = vmatprep.subr.bf16.mxu0 %v1027_v27 }
  0x35   :  { %1030 = vmatpush3.bf16.msra.mxu0 %v1029_v32 }
  0x36   :  { %1032 = vmatprep.subr.bf16.mxu0 %v1031_v33 }
  0x39   :  { %1034 = vmatpush3.bf16.msra.mxu0 %v1033_v38 }
  0x3a   :  { %1036 = vmatprep.subr.bf16.mxu0 %v1035_v39 }
  0x3d   :  { %1038 = vmatpush3.bf16.msra.mxu0 %v1037_v44 }
  0x3e   :  { %1040 = vmatprep.subr.bf16.mxu0 %v1039_v45 }
  0x41   :  { %1042 = vmatpush3.bf16.msra.mxu0 %v1041_v48 }
  0x44   :  { %439 = vmatmul.mubr.f32.vlgmr.msra.gmra.mrb[2].mxu0 %v222_v49 }
  0xf7   :  { %v834_v54 = vpop.f32.mrb[0].mxu0 }
  0xf8   :  { %v835_v56 = vpop.f32.mrb[1].mxu0 }
  0xf9   :  { %v836_v57 = vadd.f32 %v835_v56, %v834_v54  ;;  %v869_v58 = vpop.f32.mrb[0].mxu1 }
  0xfa   :  { %v870_v59 = vpop.f32.mrb[1].mxu1 }
  0xfb   :  { %v301_v60 = vadd.f32 %v836_v57, %v791_v55  ;;  %v871_v61 = vadd.f32 %v870_v59, %v869_v58 }
  0xfd   :  { %v371_v62 = vadd.f32 %v871_v61, %v301_v60  ;;  %v510_v63 = vpop.f32.mrb[2].mxu1 }
  0xfe   :  { %v925_v0 = vpop.f32.mrb[3].mxu1 }
 0x117   :  { %v904_v2 = vpop.f32.mrb[2].mxu0 }
 0x118   :  { %v905_v3 = vpop.f32.mrb[3].mxu0 }
 0x119   :  { %v906_v4 = vadd.f32 %v905_v3, %v904_v2 }
 0x11b   :  { %v441_v5 = vadd.f32 %v906_v4, %v371_v62 }
 0x11d   :  { %v511_v6 = vadd.f32 %v510_v63, %v441_v5 }
 0x11f   :  { %v514_v7 = vmax.f32 %v511_v6, 0.0 }
 0x121   :  { %931 = vmatmul.mubr.msk.f32.vlgmr.msra.gmra.mrb[4].mxu1 %vm524_vm5, %v514_v7 }
 0x122   :  { %937 = vmatprep.mubr.msk.f32.mxu1 %vm1104_vm0, %v1105_v14  ;;  %1053 = vmatpush3.bf16.msk.msra.mxu1 %vm1500_vm4, %v1051_v10 }
 0x123   :  { %1054 = vmatprep.subr.bf16.mxu1 %v1103_v1  ;;  %v690_v1 = vld [vmem:[%s1563_s7 + $0x8] sm:$0x3] }
 0x124   :  { %v1055_v18 = vpack.c.bf16 %v690_v1, %v689_v17 }
 0x1f4   :  { %v598_v12 = vpop.f32.mrb[4].mxu1 }
 0x1f5   :  { %v599_v13 = vadd.f32 %v793_v11, %v598_v12  ;;  %v932_v15 = vpop.f32.mrb[5].mxu1 }
 0x1f7   :  { %v602_v16 = vmax.f32 %v599_v13, 0.0 }
 0x1f9   :  { %938 = vmatmul.mubr.msk.f32.vlgmr.msra.gmra.mrb[6].mxu1 %vm524_vm5, %v602_v16 }
 0x1fa   :  { %944 = vmatprep.mubr.msk.f32.mxu1 %vm1104_vm0, %v1105_v14  ;;  %1057 = vmatpush3.bf16.msk.msra.mxu1 %vm1500_vm4, %v1055_v18 }
 0x2cc   :  { %v684_v21 = vpop.f32.mrb[6].mxu1 }
 0x2cd   :  { %v685_v22 = vadd.f32 %v796_v19, %v684_v21  ;;  %v939_v23 = vpop.f32.mrb[7].mxu1 }
 0x2cf   :  { %v688_v14 = vmax.f32 %v685_v22, 0.0 }
 0x2d1   :  { %945 = vmatmul.mubr.msk.f32.vlgmr.msra.gmra.mrb[8].mxu1 %vm524_vm5, %v688_v14 }
 0x3a4   :  { %v770_v20 = vpop.f32.mrb[8].mxu1 }
 0x3a5   :  { %v771_v25 = vadd.f32 %v799_v24, %v770_v20  ;;  %v946_v26 = vpop.f32.mrb[9].mxu1 }
 0x3a7   :  { %774 = vst.msk [vmem:[#allocation2] sm:$0xff] %vm524_vm5, %v771_v25 }
 0x3a8   :  { %779 = vsyncadd [#allocation3], 96  ;;  %s1107_s7 = smov [#allocation2]  }
 0x3a9   :  { %s780_s23 = sshll.u32 %s1107_s7, 4  ;;  %s781_s23 = int_to_ptr.vmem [resolvable:$true] %s780_s23 }
 0x3aa   :  { %s1078_s6 = scalar_lea.vmem %s781_s23, 32  ;;  %s1082_s24 = scalar_lea.vmem %s781_s23, 128 }
 0x3ab   :  { %p1079_p0 = scmp.ne.s32.totalorder %s781_s23, %s1078_s6  ;;  %p1083_p1 = scmp.lt.s32.totalorder %s781_s23, %s781_s23 }
 0x3ac   :  { %p1084_p2 = scmp.lt.s32.totalorder %s1082_s24, %s1078_s6 }
 0x3ae   :  { %p1085_p3 = por %p1084_p2, %p1083_p1 }
 0x3b0   :  { %p1086_p4 = pnand %p1085_p3, %p1079_p0 }
 0x3b2   :  { %1089 = shalt.err (!%p1086_p4)
}
 0x3b3   :  { %s1090_s8 = scalar_lea.hbm %s1565_s9, 32 }
 0x3b4   :  { %p1091_p5 = scmp.ne.s32.totalorder %s1565_s9, %s1090_s8  ;;  %p1094_p6 = scmp.lt.u32.totalorder %s1090_s8, %s1565_s9 }
 0x3b6   :  { %p1096_p7 = pnand %p1094_p6, %p1091_p5 }
 0x3b8   :  { %1099 = shalt.err (!%p1096_p7)
}
 0x3b9   :  { %s1108_s10 = smov 32   ;;  %s1109_s11 = smov 2  }
 0x3ba   :  { %786 = dma.vmem_to_hbm [thread:$0]  %s781_s23, 32, %s1565_s9, [#allocation3], %s1108_s10, %s1108_s10, %s1109_s11  }
 0x3bb   :  { %1100 = dma.done.wait [#allocation3], 128  }
 0x3bc   :  { %1101 = vsyncadd [#allocation3], 4294967168 }
 0x3bd   :  { %790 = vsyncpa [#allocation3], 1 }

</bundles_post_ra>
